<compile_context>
chip_gen: v7x
topology: tpu7x:2x2x1
jax: 0.10.0
libtpu: 0.0.40
codegen_flags: <defaults>
</compile_context>

<pallas_src>
import functools

import jax
import jax.numpy as jnp
from jax import lax
from jax.experimental import pallas as pl
from jax.experimental.pallas import tpu as pltpu

LANES = 128


def _mse_kernel(n_ref, x_ref, t_ref, o_ref, acc_ref, *,
                tm, steps_per_core, needs_mask):
    # n_ref:   SMEM scalar prefetch, true element count (for tail masking)
    # x_ref:   (tm, 128) VMEM tile of x (native dtype)
    # t_ref:   (tm, 128) VMEM tile of target (native dtype)
    # o_ref:   (1, 1, 128) per-core partial-sum output block
    # acc_ref: (1, 128) f32 accumulator, persistent across the inner grid axis
    j = pl.program_id(1)

    @pl.when(j == 0)
    def _():
        acc_ref[...] = jnp.zeros_like(acc_ref)

    d = x_ref[...].astype(jnp.float32) - t_ref[...].astype(jnp.float32)
    d2 = d * d

    if needs_mask:
        # Logical (un-clamped) block index -> global flat element index.
        b = pl.program_id(0) * steps_per_core + j
        row = lax.broadcasted_iota(jnp.int32, (tm, LANES), 0) + b * tm
        lane = lax.broadcasted_iota(jnp.int32, (tm, LANES), 1)
        idx = row * LANES + lane
        d2 = jnp.where(idx < n_ref[0], d2, 0.0)

    # Reduce over the sublane axis each step -> tiny accumulator, no full-tile
    # read-modify-write store traffic.
    acc_ref[...] += jnp.sum(d2, axis=0, keepdims=True)

    @pl.when(j == steps_per_core - 1)
    def _():
        o_ref[0] = acc_ref[...]


def content_loss(x, target, *, tile_rows=2048, num_cores=2):
    """MSE(x, target) with mean reduction over all elements (== nn.MSELoss())."""
    assert x.shape == target.shape, "ContentLoss requires matching shapes"
    assert x.dtype == target.dtype, "ContentLoss requires matching dtypes"
    n_true = int(x.size)
    assert n_true > 0, "empty input"

    xf = x.reshape(-1)
    tf = target.reshape(-1)

    # Minimal tail pad (<=127 elems) only when N is not a multiple of 128.
    rem = n_true % LANES
    if rem:
        pad = LANES - rem
        zpad = jnp.zeros((pad,), dtype=x.dtype)
        xf = jnp.concatenate([xf, zpad])
        tf = jnp.concatenate([tf, zpad])
    rows = xf.size // LANES
    x2d = xf.reshape(rows, LANES)
    t2d = tf.reshape(rows, LANES)

    # Sublane packing granularity for the block's second-to-last dim.
    itemsize = jnp.dtype(x.dtype).itemsize
    packing = {4: 8, 2: 16, 1: 32}.get(itemsize, 8)

    if rows <= tile_rows:
        tm = rows                                   # full-dim block: always legal
    else:
        tm = max((tile_rows // packing) * packing, packing)

    total_blocks = -(-rows // tm)                   # ceil
    nc = min(num_cores, total_blocks)               # v7x: 2 TCs; v5e/v6e run it serially
    spc = -(-total_blocks // nc)                    # steps per core (ceil)
    last_block = total_blocks - 1

    # Mask is only required when there is a ragged tail, a partially padded
    # last row-block, or a clamped (duplicated) block from an odd core split.
    needs_mask = not (n_true == rows * LANES
                      and rows % tm == 0
                      and total_blocks % nc == 0)

    # int32 index arithmetic guard for the in-kernel mask.
    assert nc * spc * tm * LANES < 2 ** 31, "input too large for int32 masking"

    n_arr = jnp.array([n_true], dtype=jnp.int32)

    def in_map(c, j, n):                            # n = prefetch ref (unused)
        del n
        return (jnp.minimum(c * spc + j, last_block), 0)

    kernel = functools.partial(_mse_kernel, tm=tm, steps_per_core=spc,
                               needs_mask=needs_mask)

    partials = pl.pallas_call(
        kernel,
        out_shape=jax.ShapeDtypeStruct((nc, 1, LANES), jnp.float32),
        grid_spec=pltpu.PrefetchScalarGridSpec(
            num_scalar_prefetch=1,
            grid=(nc, spc),
            in_specs=[
                pl.BlockSpec((tm, LANES), in_map),
                pl.BlockSpec((tm, LANES), in_map),
            ],
            out_specs=pl.BlockSpec((1, 1, LANES), lambda c, j, n: (c, 0, 0)),
            scratch_shapes=[pltpu.VMEM((1, LANES), jnp.float32)],
        ),
        compiler_params=pltpu.CompilerParams(
            dimension_semantics=("parallel", "arbitrary")),
    )(n_arr, x2d, t2d)

    return jnp.sum(partials) / jnp.float32(n_true)


if __name__ == "__main__":
    key = jax.random.PRNGKey(0)
    kx, kt = jax.random.split(key)

    # 1) Primary case: NCHW feature maps (aligned, single block, no mask path).
    x = jax.random.normal(kx, (2, 4, 16, 16), dtype=jnp.float32)
    target = jax.random.normal(kt, (2, 4, 16, 16), dtype=jnp.float32)
    loss = content_loss(x, target)
    jax.block_until_ready(loss)
    ref = jnp.mean((x - target) ** 2)
    assert jnp.allclose(loss, ref, rtol=1e-5, atol=1e-6), (loss, ref)

    k1, k2 = jax.random.split(kt)

    # 2) Ragged element count (exercises in-kernel tail masking).
    xr = jax.random.normal(k1, (2, 3, 7, 11), dtype=jnp.float32)
    tr = jax.random.normal(k2, (2, 3, 7, 11), dtype=jnp.float32)
    loss_r = content_loss(xr, tr)
    ref_r = jnp.mean((xr - tr) ** 2)
    assert jnp.allclose(loss_r, ref_r, rtol=1e-5, atol=1e-6), (loss_r, ref_r)

    # 3) bf16 native dtype, multi-block, 2-way core split (small tile override).
    xb = jax.random.normal(k1, (1, 8, 64, 64), dtype=jnp.bfloat16)
    tb = jax.random.normal(k2, (1, 8, 64, 64), dtype=jnp.bfloat16)
    loss_b = content_loss(xb, tb, tile_rows=16)
    ref_b = jnp.mean((xb.astype(jnp.float32) - tb.astype(jnp.float32)) ** 2)
    assert jnp.allclose(loss_b, ref_b, rtol=1e-4, atol=1e-5), (loss_b, ref_b)

    # 4) f32 multi-block with odd core split (exercises clamped block + mask).
    xc = jax.random.normal(k1, (1, 4, 64, 64), dtype=jnp.float32)
    tc = jax.random.normal(k2, (1, 4, 64, 64), dtype=jnp.float32)
    loss_c = content_loss(xc, tc, tile_rows=48)
    ref_c = jnp.mean((xc - tc) ** 2)
    assert jnp.allclose(loss_c, ref_c, rtol=1e-5, atol=1e-6), (loss_c, ref_c)

    jax.block_until_ready((loss, loss_r, loss_b, loss_c))
    print("KERNEL_OK")
</pallas_src>

<mosaic_0001>
module attributes {stable_mosaic.version = 11 : i64} {
  func.func @_mse_kernel(%arg0: i32, %arg1: i32, %arg2: memref<1xi32, #tpu.memory_space<smem>>, %arg3: memref<16x128xf32, #tpu.memory_space<vmem>>, %arg4: memref<16x128xf32, #tpu.memory_space<vmem>>, %arg5: memref<1x1x128xf32, #tpu.memory_space<vmem>>, %arg6: memref<1x128xf32, #tpu.memory_space<vmem>>) attributes {dimension_semantics = [#tpu.dimension_semantics<parallel>, #tpu.dimension_semantics<arbitrary>], iteration_bounds = array<i64: 1, 1>, scalar_prefetch = 1 : i64, scratch_operands = 1 : i64, tpu.core_type = #tpu.core_type<tc>, window_params = [{transform_indices = @transform_0, window_bounds = array<i64: 16, 128>}, {transform_indices = @transform_1, window_bounds = array<i64: 16, 128>}, {transform_indices = @transform_2, window_bounds = array<i64: 1, 1, 128>}]} {
    %c0_i32 = arith.constant 0 : i32
    %0 = arith.cmpi eq, %arg1, %c0_i32 : i32
    %1 = arith.extui %0 : i1 to i32
    %c0_i32_0 = arith.constant 0 : i32
    %2 = arith.cmpi ne, %1, %c0_i32_0 : i32
    scf.if %2 {
      %cst_10 = arith.constant 0.000000e+00 : f32
      %15 = vector.broadcast %cst_10 : f32 to vector<1x128xf32>
      %c0_11 = arith.constant 0 : index
      %c0_12 = arith.constant 0 : index
      %16 = vector.load %arg6[%c0_11, %c0_12] : memref<1x128xf32, #tpu.memory_space<vmem>>, vector<1x128xf32>
      tpu.vector_store %arg6[%c0_11, %c0_12], %15 {strides = array<i32>} : memref<1x128xf32, #tpu.memory_space<vmem>>, vector<1x128xf32>,
    } else {
    }
    %c0 = arith.constant 0 : index
    %c0_1 = arith.constant 0 : index
    %3 = vector.load %arg3[%c0, %c0_1] : memref<16x128xf32, #tpu.memory_space<vmem>>, vector<16x128xf32>
    %c0_2 = arith.constant 0 : index
    %c0_3 = arith.constant 0 : index
    %4 = vector.load %arg4[%c0_2, %c0_3] : memref<16x128xf32, #tpu.memory_space<vmem>>, vector<16x128xf32>
    %5 = arith.subf %3, %4 : vector<16x128xf32>
    %6 = arith.mulf %5, %5 : vector<16x128xf32>
    %c0_4 = arith.constant 0 : index
    %c0_5 = arith.constant 0 : index
    %7 = vector.load %arg6[%c0_4, %c0_5] : memref<1x128xf32, #tpu.memory_space<vmem>>, vector<1x128xf32>
    %cst = arith.constant dense<0.000000e+00> : vector<128xf32>
    %8 = vector.multi_reduction <add>, %6, %cst [0] : vector<16x128xf32> to vector<128xf32>
    %9 = vector.shape_cast %8 : vector<128xf32> to vector<1x128xf32>
    %10 = arith.addf %7, %9 : vector<1x128xf32>
    %c0_6 = arith.constant 0 : index
    %c0_7 = arith.constant 0 : index
    %11 = vector.load %arg6[%c0_6, %c0_7] : memref<1x128xf32, #tpu.memory_space<vmem>>, vector<1x128xf32>
    tpu.vector_store %arg6[%c0_6, %c0_7], %10 {strides = array<i32>} : memref<1x128xf32, #tpu.memory_space<vmem>>, vector<1x128xf32>,
    %c0_i32_8 = arith.constant 0 : i32
    %12 = arith.cmpi eq, %arg1, %c0_i32_8 : i32
    %13 = arith.extui %12 : i1 to i32
    %c0_i32_9 = arith.constant 0 : i32
    %14 = arith.cmpi ne, %13, %c0_i32_9 : i32
    scf.if %14 {
      %c0_10 = arith.constant 0 : index
      %c0_11 = arith.constant 0 : index
      %15 = vector.load %arg6[%c0_10, %c0_11] : memref<1x128xf32, #tpu.memory_space<vmem>>, vector<1x128xf32>
      %c0_12 = arith.constant 0 : index
      %c0_13 = arith.constant 0 : index
      %c0_14 = arith.constant 0 : index
      %16 = vector.load %arg5[%c0_12, %c0_13, %c0_14] : memref<1x1x128xf32, #tpu.memory_space<vmem>>, vector<1x1x128xf32>
      %17 = vector.shape_cast %16 : vector<1x1x128xf32> to vector<1x128xf32>
      %18 = vector.shape_cast %15 : vector<1x128xf32> to vector<1x1x128xf32>
      tpu.vector_store %arg5[%c0_12, %c0_13, %c0_14], %18 {strides = array<i32>} : memref<1x1x128xf32, #tpu.memory_space<vmem>>, vector<1x1x128xf32>,
    } else {
    }
    return
  }
  func.func @transform_0(%arg0: i32, %arg1: i32, %arg2: memref<1xi32, #tpu.memory_space<smem>>) -> (i32, i32) {
    %c1_i32 = arith.constant 1 : i32
    %0 = arith.muli %arg0, %c1_i32 : i32
    %1 = arith.addi %0, %arg1 : i32
    %c0_i32 = arith.constant 0 : i32
    %2 = arith.minsi %1, %c0_i32 : i32
    %c0_i32_0 = arith.constant 0 : i32
    %c0_i32_1 = arith.constant 0 : i32
    return %2, %c0_i32_0 : i32, i32
  }
  func.func @transform_1(%arg0: i32, %arg1: i32, %arg2: memref<1xi32, #tpu.memory_space<smem>>) -> (i32, i32) {
    %c1_i32 = arith.constant 1 : i32
    %0 = arith.muli %arg0, %c1_i32 : i32
    %1 = arith.addi %0, %arg1 : i32
    %c0_i32 = arith.constant 0 : i32
    %2 = arith.minsi %1, %c0_i32 : i32
    %c0_i32_0 = arith.constant 0 : i32
    %c0_i32_1 = arith.constant 0 : i32
    return %2, %c0_i32_0 : i32, i32
  }
  func.func @transform_2(%arg0: i32, %arg1: i32, %arg2: memref<1xi32, #tpu.memory_space<smem>>) -> (i32, i32, i32) {
    %c0_i32 = arith.constant 0 : i32
    %c0_i32_0 = arith.constant 0 : i32
    %c0_i32_1 = arith.constant 0 : i32
    return %arg0, %c0_i32, %c0_i32_0 : i32, i32, i32
  }
}

</mosaic_0001>

<bundles_post_ra>
// kernel: tpu_custom_call.1
= control target key start
LH: loop header
LB: loop body
LE: loop exit
PB: predicated region body
PF: predicated region fallthrough
CT: control target
= control target key end

     0   :  { %9 = vsyncpa [#allocation6], 0  ;;  %s250_s0 = inlined_call_operand.<no memory space> [shape: s32[1], index: 0, kind: input, shape index: {}]   ;;  %s251_s1 = inlined_call_operand.hbm [shape: f32[16,128], index: 1, kind: input, shape index: {}]   ;;  %s252_s2 = inlined_call_operand.hbm [shape: f32[16,128], index: 2, kind: input, shape index: {}]   ;;  %s253_s3 = inlined_call_operand.hbm [shape: f32[1,1,128], index: 3, kind: output, shape index: {}]  }
   0x1   :  { %10 = vsyncpa [#allocation9], 0 }
   0x2   :  { %11 = vsyncpa [#allocation7], 0  ;;  %s188_s12 = smov [#allocation5]   ;;  %s116_s16 = scalar_lea.hbm %s251_s1, 256 }
   0x3   :  { %s23_s13 = sshll.u32 %s188_s12, 4  ;;  %p117_p0 = scmp.ne.s32.totalorder %s251_s1, %s116_s16  ;;  %s24_s13 = int_to_ptr.vmem [resolvable:$true] %s23_s13 }
   0x4   :  { %p120_p1 = scmp.lt.u32.totalorder %s116_s16, %s251_s1 }
   0x6   :  { %p122_p2 = pnand %p120_p1, %p117_p0 }
   0x8   :  { %125 = shalt.err (!%p122_p2)
}
   0x9   :  { %s126_s20 = scalar_lea.vmem %s24_s13, 256  ;;  %p131_p4 = scmp.lt.s32.totalorder %s24_s13, %s24_s13 }
   0xa   :  { %p127_p3 = scmp.ne.s32.totalorder %s24_s13, %s126_s20  ;;  %p132_p5 = scmp.lt.s32.totalorder %s126_s20, %s126_s20 }
   0xc   :  { %p133_p6 = por %p132_p5, %p131_p4 }
   0xe   :  { %p134_p7 = pnand %p133_p6, %p127_p3 }
  0x10   :  { %137 = shalt.err (!%p134_p7)
}
  0x11   :  { %s189_s21 = smov 128   ;;  %s190_s22 = smov 8  }
  0x12   :  { %29 = dma.hbm_to_vmem [thread:$0]  %s251_s1, 256, %s24_s13, [#allocation6], %s189_s21, %s189_s21, %s190_s22  }
  0x13   :  { %s191_s25 = smov [#allocation8]   ;;  %s138_s29 = scalar_lea.hbm %s252_s2, 256 }
  0x14   :  { %s41_s26 = sshll.u32 %s191_s25, 4  ;;  %p139_p8 = scmp.ne.s32.totalorder %s252_s2, %s138_s29  ;;  %s42_s26 = int_to_ptr.vmem [resolvable:$true] %s41_s26 }
  0x15   :  { %p142_p9 = scmp.lt.u32.totalorder %s138_s29, %s252_s2 }
  0x17   :  { %p144_p10 = pnand %p142_p9, %p139_p8 }
  0x19   :  { %147 = shalt.err (!%p144_p10)
}
  0x1a   :  { %s148_s7 = scalar_lea.vmem %s42_s26, 256  ;;  %p153_p12 = scmp.lt.s32.totalorder %s42_s26, %s42_s26 }
  0x1b   :  { %p149_p11 = scmp.ne.s32.totalorder %s42_s26, %s148_s7  ;;  %p154_p13 = scmp.lt.s32.totalorder %s148_s7, %s148_s7 }
  0x1d   :  { %p155_p0 = por %p154_p13, %p153_p12 }
  0x1f   :  { %p156_p1 = pnand %p155_p0, %p149_p11 }
  0x21   :  { %159 = shalt.err (!%p156_p1)
}
  0x22   :  { %47 = dma.hbm_to_vmem [thread:$0]  %s252_s2, 256, %s42_s26, [#allocation9], %s189_s21, %s189_s21, %s190_s22  }
  0x23   :  { %182 = dma.done.wait [#allocation6], 256  }
  0x24   :  { %183 = vsyncadd [#allocation6], 4294967040 }
  0x25   :  { %184 = dma.done.wait [#allocation9], 256  }
  0x26   :  { %185 = vsyncadd [#allocation9], 4294967040  ;;  %v192_v0 = vmov 0.0   ;;  %v67_v1 = vld [vmem:[#allocation5] sm:$0xff]  ;;  %v68_v2 = vld [vmem:[#allocation5 + $0x8] sm:$0xff]  ;;  %s193_s2 = smov [#allocation10]  }
  0x27   :  { %66 = vst [vmem:[#allocation2] sm:$0x1] %v192_v0  ;;  %v69_v3 = vld [vmem:[#allocation8] sm:$0xff]  ;;  %v70_v4 = vld [vmem:[#allocation8 + $0x8] sm:$0xff]  ;;  %s96_s9 = sshll.u32 %s193_s2, 4  ;;  %s97_s9 = int_to_ptr.vmem [resolvable:$true] %s96_s9 }
  0x28   :  { %v71_v5 = vsub.f32 %v67_v1, %v69_v3  ;;  %v72_v6 = vsub.f32 %v68_v2, %v70_v4  ;;  %s160_s10 = scalar_lea.vmem %s97_s9, 16  ;;  %s164_s11 = scalar_lea.vmem %s97_s9, 32 }
  0x29   :  { %p161_p2 = scmp.ne.s32.totalorder %s97_s9, %s160_s10  ;;  %p165_p3 = scmp.lt.s32.totalorder %s97_s9, %s97_s9 }
  0x2a   :  { %v73_v7 = vmul.f32 %v71_v5, %v71_v5  ;;  %v74_v8 = vmul.f32 %v72_v6, %v72_v6  ;;  %p166_p4 = scmp.lt.s32.totalorder %s164_s11, %s160_s10 }
  0x2c   :  { %v76_v9 = vadd.f32 %v74_v8, %v73_v7  ;;  %p167_p5 = por %p166_p4, %p165_p3 }
  0x2e   :  { %v77_v10 = vrot.slane %v76_v9, 4  ;;  %v75_v15 = vld [vmem:[#allocation2] sm:$0x1]  ;;  %p168_p6 = pnand %p167_p5, %p161_p2 }
  0x30   :  { %v78_v11 = vadd.f32 %v77_v10, %v76_v9 }
  0x32   :  { %v79_v12 = vrot.slane %v78_v11, 2 }
  0x34   :  { %v80_v13 = vadd.f32 %v79_v12, %v78_v11 }
  0x36   :  { %v81_v14 = vrot.slane %v80_v13, 1 }
  0x38   :  { %v82_v16 = vadd.f32 %v81_v14, %v80_v13 }
  0x3a   :  { %v83_v17 = vadd.f32 %v82_v16, %v75_v15 }
  0x3c   :  { %84 = vst [vmem:[#allocation2] sm:$0x1] %v83_v17 }
  0x43   :  { %v88_v18 = vld [vmem:[#allocation2] sm:$0x1] }
  0x44   :  { %89 = vst [vmem:[#allocation10] sm:$0x1] %v88_v18 }
  0x45   :  { %171 = shalt.err (!%p168_p6)
}
  0x46   :  { %s172_s14 = scalar_lea.hbm %s253_s3, 16 }
  0x47   :  { %p173_p7 = scmp.ne.s32.totalorder %s253_s3, %s172_s14  ;;  %p176_p8 = scmp.lt.u32.totalorder %s172_s14, %s253_s3 }
  0x49   :  { %p178_p9 = pnand %p176_p8, %p173_p7 }
  0x4b   :  { %181 = shalt.err (!%p178_p9)
}
  0x4c   :  { %99 = dma.vmem_to_hbm [thread:$0]  %s97_s9, 16, %s253_s3, [#allocation7]  }
  0x4d   :  { %186 = dma.done.wait [#allocation7], 16  }
  0x4e   :  { %187 = vsyncadd [#allocation7], 4294967280 }
  0x4f   :  { %103 = vsyncpa [#allocation6], 1 }
  0x50   :  { %104 = vsyncpa [#allocation9], 1 }
  0x51   :  { %105 = vsyncpa [#allocation7], 1 }

</bundles_post_ra>
